<compile_context>
chip_gen: v6e
topology: v6e:2x2x1
jax: 0.10.0
libtpu: 0.0.40
codegen_flags: <defaults>
</compile_context>

<pallas_src>
import functools

import jax
import jax.numpy as jnp
from jax.experimental import pallas as pl
from jax.experimental.pallas import tpu as pltpu


def _round_up(v: int, m: int) -> int:
    return (v + m - 1) // m * m


def _ln_sampled_kernel(x_ref, w_ref, b_ref, o_ref, *, emb_choice: int, eps: float):
    """LayerNorm over the first `emb_choice` of the loaded columns.

    x_ref: (TM, e_active); w_ref/b_ref: (1, e_active), zeroed past emb_choice;
    o_ref: (TM, e_active).
    """
    x = x_ref[...].astype(jnp.float32)
    e_active = x.shape[-1]
    inv_n = 1.0 / emb_choice

    if emb_choice < e_active:
        # Single f32 column mask, reused for mean masking and diff masking.
        col = jax.lax.broadcasted_iota(jnp.int32, (1, e_active), 1)
        mask = (col < emb_choice).astype(jnp.float32)
        mean = jnp.sum(x * mask, axis=-1, keepdims=True) * inv_n
        diff = (x - mean) * mask
    else:
        mean = jnp.sum(x, axis=-1, keepdims=True) * inv_n
        diff = x - mean

    # Two-pass (stable) biased variance, matching F.layer_norm.
    var = jnp.sum(diff * diff, axis=-1, keepdims=True) * inv_n
    inv_std = jax.lax.rsqrt(var + eps)

    w = w_ref[...].astype(jnp.float32)   # zero past emb_choice -> those cols output 0
    b = b_ref[...].astype(jnp.float32)
    o_ref[...] = ((diff * inv_std) * w + b).astype(o_ref.dtype)


def layer_norm_sampled(x, weight, bias, *, emb_choice: int, super_emb: int,
                       eps: float = 1e-5, row_tile: int | None = None,
                       vmem_limit_bytes: int | None = None):
    """x: (B, S, super_emb) -> (B, S, super_emb); LN on the first emb_choice
    features, zeros elsewhere (== PyTorch LayerNormSampled.forward)."""
    B, S, E = x.shape
    assert E == super_emb
    assert 0 < emb_choice <= super_emb
    rows = B * S
    out_dtype = x.dtype
    in_bytes = jnp.dtype(x.dtype).itemsize
    out_bytes = jnp.dtype(out_dtype).itemsize

    # Columns actually read / written by the kernel: either a 128-multiple
    # prefix of the embedding or the whole (possibly unaligned) last dim.
    e_active = _round_up(emb_choice, 128)
    if e_active > E:
        e_active = E

    # Sublane granularity: sub-32-bit dtypes pack along sublanes.
    sublane = max(8,
                  {4: 8, 2: 16, 1: 32}.get(in_bytes, 8),
                  {4: 8, 2: 16, 1: 32}.get(out_bytes, 8))

    # Generation-aware hardware query (conservative fallbacks).
    vmem_cap = 64 * 1024 * 1024
    num_cores = 1
    try:
        info = pltpu.get_tpu_info()
        vmem_cap = int(getattr(info, "vmem_capacity_bytes", vmem_cap))
        for attr in ("num_cores", "tensorcores_per_chip", "num_tensorcores",
                     "core_count"):
            v = getattr(info, attr, None)
            if isinstance(v, int) and v > 0:
                num_cores = v
                break
    except Exception:  # e.g. interpret mode
        pass

    # Per-row VMEM cost: double-buffered input + output blocks plus ~4
    # full-tile f32 temporaries (x_f32, masked product, diff, y).
    per_row = (2 * e_active * in_bytes
               + 2 * e_active * out_bytes
               + 4 * 4 * e_active)

    if row_tile is None:
        # ~16 MiB tile budget on v7x (64 MiB VMEM/core), ~24 MiB on v5e/v6e;
        # row_tile capped at 1024 (HBM-roofline knee is ~512-1024 rows).
        budget = min(vmem_cap // 4, 24 * 1024 * 1024)
        rt = max(sublane, min(budget // per_row, 1024))
        rt = (rt // sublane) * sublane
        rt = min(rt, _round_up(rows, sublane))
        if num_cores > 1:
            # v7x megacore: aim for >= 2 grid steps per TensorCore so every
            # core keeps DMA/compute overlap; never shrink below one sublane.
            target_steps = 2 * num_cores
            if rows > sublane * target_steps and pl.cdiv(rows, rt) < target_steps:
                rt = max(sublane, _round_up(pl.cdiv(rows, target_steps), sublane))
        row_tile = rt
    row_tile = max(sublane, (row_tile // sublane) * sublane)

    grid = pl.cdiv(rows, row_tile)   # ragged last block: OOB writes are dropped

    if vmem_limit_bytes is None:
        needed = row_tile * per_row + 8 * e_active * 4   # + weight/bias/mask
        vmem_limit_bytes = min(vmem_cap, max(2 * needed, 8 * 1024 * 1024))

    # Free reshape (no copy): (B, S, E) -> (rows, E).
    x2 = x.reshape(rows, E)

    # Pre-masked f32 weight/bias (zeros past emb_choice) -> kernel needs no final select.
    wa = jnp.pad(weight[:emb_choice].astype(jnp.float32),
                 (0, e_active - emb_choice)).reshape(1, e_active)
    ba = jnp.pad(bias[:emb_choice].astype(jnp.float32),
                 (0, e_active - emb_choice)).reshape(1, e_active)

    kernel = functools.partial(_ln_sampled_kernel,
                               emb_choice=int(emb_choice), eps=float(eps))

    cost = pl.CostEstimate(
        flops=8 * rows * e_active,
        transcendentals=rows,
        bytes_accessed=rows * e_active * (in_bytes + out_bytes),
    )

    out2 = pl.pallas_call(
        kernel,
        out_shape=jax.ShapeDtypeStruct((rows, e_active), out_dtype),
        grid_spec=pltpu.PrefetchScalarGridSpec(
            num_scalar_prefetch=0,
            grid=(grid,),
            in_specs=[
                # Only the active prefix of the embedding is DMA'd from HBM.
                pl.BlockSpec((row_tile, e_active), lambda i: (i, 0)),
                pl.BlockSpec((1, e_active), lambda i: (0, 0)),
                pl.BlockSpec((1, e_active), lambda i: (0, 0)),
            ],
            out_specs=pl.BlockSpec((row_tile, e_active), lambda i: (i, 0)),
        ),
        compiler_params=pltpu.CompilerParams(
            dimension_semantics=("parallel",),
            vmem_limit_bytes=int(vmem_limit_bytes)),
        cost_estimate=cost,
    )(x2, wa, ba)

    out3 = out2.reshape(B, S, e_active)
    if e_active < E:
        # Zero tail produced outside the kernel (lazily fusable into the consumer);
        # the kernel never writes the dead super-embedding columns.
        out3 = jnp.pad(out3, ((0, 0), (0, 0), (0, E - e_active)))
    return out3


def _reference(x, weight, bias, emb_choice, super_emb, eps=1e-5):
    xs = x[:, :, :emb_choice].astype(jnp.float32)
    mean = xs.mean(-1, keepdims=True)
    var = ((xs - mean) ** 2).mean(-1, keepdims=True)
    y = (xs - mean) * jax.lax.rsqrt(var + eps) * weight[:emb_choice] + bias[:emb_choice]
    pad = super_emb - emb_choice
    if pad > 0:
        y = jnp.pad(y, ((0, 0), (0, 0), (0, pad)))
    return y.astype(x.dtype)


if __name__ == "__main__":
    # Module config: super_emb = full LayerNorm width, emb_choice = sampled sub-width.
    B, S = 2, 8
    SUPER_EMB = 64
    EMB_CHOICE = 48
    EPS = 1e-5

    key = jax.random.PRNGKey(0)
    kx, kw, kb = jax.random.split(key, 3)
    x = jax.random.normal(kx, (B, S, SUPER_EMB), dtype=jnp.float32)
    # Deterministic synthetic LayerNorm parameters (shape = (super_emb,)).
    weight = 1.0 + 0.01 * jax.random.normal(kw, (SUPER_EMB,), dtype=jnp.float32)
    bias = 0.01 * jax.random.normal(kb, (SUPER_EMB,), dtype=jnp.float32)

    out = layer_norm_sampled(x, weight, bias,
                             emb_choice=EMB_CHOICE, super_emb=SUPER_EMB, eps=EPS)
    out = jax.block_until_ready(out)

    ref = _reference(x, weight, bias, EMB_CHOICE, SUPER_EMB, EPS)
    assert out.shape == (B, S, SUPER_EMB)
    assert jnp.allclose(out, ref, atol=1e-5, rtol=1e-5), "mismatch vs reference"
    print("KERNEL_OK")
</pallas_src>

<mosaic_0001>
module attributes {stable_mosaic.version = 11 : i64} {
  func.func @_ln_sampled_kernel(%arg0: i32, %arg1: memref<16x64xf32, #tpu.memory_space<vmem>>, %arg2: memref<1x64xf32, #tpu.memory_space<vmem>>, %arg3: memref<1x64xf32, #tpu.memory_space<vmem>>, %arg4: memref<16x64xf32, #tpu.memory_space<vmem>>) attributes {dimension_semantics = [#tpu.dimension_semantics<parallel>], iteration_bounds = array<i64: 1>, scalar_prefetch = 0 : i64, scratch_operands = 0 : i64, tpu.core_type = #tpu.core_type<tc>, window_params = [{transform_indices = @transform_0, window_bounds = array<i64: 16, 64>}, {pipeline_mode = #tpu.pipeline_mode<synchronous>, transform_indices = @transform_1, window_bounds = array<i64: 1, 64>}, {pipeline_mode = #tpu.pipeline_mode<synchronous>, transform_indices = @transform_2, window_bounds = array<i64: 1, 64>}, {transform_indices = @transform_3, window_bounds = array<i64: 16, 64>}]} {
    %c0 = arith.constant 0 : index
    %c0_0 = arith.constant 0 : index
    %0 = vector.load %arg1[%c0, %c0_0] : memref<16x64xf32, #tpu.memory_space<vmem>>, vector<16x64xf32>
    %1 = tpu.iota {dimensions = array<i32: 1>} : vector<1x64xi32>
    %c48_i32 = arith.constant 48 : i32
    %2 = vector.broadcast %c48_i32 : i32 to vector<1x64xi32>
    %3 = arith.cmpi slt, %1, %2 : vector<1x64xi32>
    %4 = arith.extui %3 : vector<1x64xi1> to vector<1x64xi32>
    %5 = arith.sitofp %4 : vector<1x64xi32> to vector<1x64xf32>
    %6 = vector.broadcast %5 : vector<1x64xf32> to vector<16x64xf32>
    %7 = arith.mulf %0, %6 : vector<16x64xf32>
    %cst = arith.constant dense<0.000000e+00> : vector<16xf32>
    %8 = vector.multi_reduction <add>, %7, %cst [1] : vector<16x64xf32> to vector<16xf32>
    %9 = vector.shape_cast %8 : vector<16xf32> to vector<16x1xf32>
    %cst_1 = arith.constant 0.020833334 : f32
    %10 = vector.broadcast %cst_1 : f32 to vector<16x1xf32>
    %11 = arith.mulf %9, %10 : vector<16x1xf32>
    %12 = vector.broadcast %11 : vector<16x1xf32> to vector<16x64xf32>
    %13 = arith.subf %0, %12 : vector<16x64xf32>
    %14 = vector.broadcast %5 : vector<1x64xf32> to vector<16x64xf32>
    %15 = arith.mulf %13, %14 : vector<16x64xf32>
    %16 = arith.mulf %15, %15 : vector<16x64xf32>
    %cst_2 = arith.constant dense<0.000000e+00> : vector<16xf32>
    %17 = vector.multi_reduction <add>, %16, %cst_2 [1] : vector<16x64xf32> to vector<16xf32>
    %18 = vector.shape_cast %17 : vector<16xf32> to vector<16x1xf32>
    %cst_3 = arith.constant 0.020833334 : f32
    %19 = vector.broadcast %cst_3 : f32 to vector<16x1xf32>
    %20 = arith.mulf %18, %19 : vector<16x1xf32>
    %cst_4 = arith.constant 9.99999974E-6 : f32
    %21 = vector.broadcast %cst_4 : f32 to vector<16x1xf32>
    %22 = arith.addf %20, %21 : vector<16x1xf32>
    %23 = math.rsqrt %22 : vector<16x1xf32>
    %c0_5 = arith.constant 0 : index
    %c0_6 = arith.constant 0 : index
    %24 = vector.load %arg2[%c0_5, %c0_6] : memref<1x64xf32, #tpu.memory_space<vmem>>, vector<1x64xf32>
    %c0_7 = arith.constant 0 : index
    %c0_8 = arith.constant 0 : index
    %25 = vector.load %arg3[%c0_7, %c0_8] : memref<1x64xf32, #tpu.memory_space<vmem>>, vector<1x64xf32>
    %26 = vector.broadcast %23 : vector<16x1xf32> to vector<16x64xf32>
    %27 = arith.mulf %15, %26 : vector<16x64xf32>
    %28 = vector.broadcast %24 : vector<1x64xf32> to vector<16x64xf32>
    %29 = arith.mulf %27, %28 : vector<16x64xf32>
    %30 = vector.broadcast %25 : vector<1x64xf32> to vector<16x64xf32>
    %31 = arith.addf %29, %30 : vector<16x64xf32>
    %c0_9 = arith.constant 0 : index
    %c0_10 = arith.constant 0 : index
    %32 = vector.load %arg4[%c0_9, %c0_10] : memref<16x64xf32, #tpu.memory_space<vmem>>, vector<16x64xf32>
    tpu.vector_store %arg4[%c0_9, %c0_10], %31 {strides = array<i32>} : memref<16x64xf32, #tpu.memory_space<vmem>>, vector<16x64xf32>,
    return
  }
  func.func @transform_0(%arg0: i32) -> (i32, i32) {
    %c0_i32 = arith.constant 0 : i32
    %c0_i32_0 = arith.constant 0 : i32
    return %arg0, %c0_i32 : i32, i32
  }
  func.func @transform_1(%arg0: i32) -> (i32, i32) {
    %c0_i32 = arith.constant 0 : i32
    %c0_i32_0 = arith.constant 0 : i32
    %c0_i32_1 = arith.constant 0 : i32
    return %c0_i32, %c0_i32_0 : i32, i32
  }
  func.func @transform_2(%arg0: i32) -> (i32, i32) {
    %c0_i32 = arith.constant 0 : i32
    %c0_i32_0 = arith.constant 0 : i32
    %c0_i32_1 = arith.constant 0 : i32
    return %c0_i32, %c0_i32_0 : i32, i32
  }
  func.func @transform_3(%arg0: i32) -> (i32, i32) {
    %c0_i32 = arith.constant 0 : i32
    %c0_i32_0 = arith.constant 0 : i32
    return %arg0, %c0_i32 : i32, i32
  }
}

</mosaic_0001>

<bundles_post_ra>
// kernel: tpu_custom_call.1
= control target key start
LH: loop header
LB: loop body
LE: loop exit
PB: predicated region body
PF: predicated region fallthrough
CT: control target
= control target key end

     0   :  { %8 = vsyncpa [#allocation3], 0  ;;  %s209_s0 = inlined_call_operand.hbm [shape: f32[16,64], index: 0, kind: input, shape index: {}]   ;;  %s210_s1 = inlined_call_operand.vmem [shape: f32[1,64], index: 1, kind: input, shape index: {}]   ;;  %s211_s2 = inlined_call_operand.vmem [shape: f32[1,64], index: 2, kind: input, shape index: {}]   ;;  %s212_s3 = inlined_call_operand.hbm [shape: f32[16,64], index: 3, kind: output, shape index: {}]  }
   0x1   :  { %9 = vsyncpa [#allocation4], 0  ;;  %s160_s12 = smov [#allocation2]  }
   0x2   :  { %s15_s13 = sshll.u32 %s160_s12, 4  ;;  %s16_s13 = int_to_ptr.vmem [resolvable:$true] %s15_s13 }
   0x3   :  { %s124_s14 = scalar_lea.vmem %s16_s13, 256  ;;  %p129_p1 = scmp.lt.s32.totalorder %s16_s13, %s16_s13 }
   0x4   :  { %p125_p0 = scmp.ne.s32.totalorder %s16_s13, %s124_s14  ;;  %p130_p2 = scmp.lt.s32.totalorder %s124_s14, %s124_s14 }
   0x6   :  { %p131_p3 = por %p130_p2, %p129_p1 }
   0x8   :  { %p132_p4 = pnand %p131_p3, %p125_p0 }
   0xa   :  { %135 = shalt.err (!%p132_p4)
}
   0xb   :  { %s161_s15 = smov 128   ;;  %s162_s16 = smov 8  }
   0xc   :  { %21 = dma.hbm_to_vmem [thread:$0]  %s209_s0, 256, %s16_s13, [#allocation3], %s161_s15, %s161_s15, %s162_s16  }
   0xd   :  { %156 = dma.done.wait [#allocation3], 256  }
   0xe   :  { %157 = vsyncadd [#allocation3], 4294967040  ;;  %v31_v0 = vlaneseq  ;;  %v163_v2 = vmov 0.0   ;;  %v29_v4 = vld [vmem:[#allocation2] sm:$0xff]  ;;  %vm38_vm1 = vcmask 523264   ;;  %v30_v5 = vld [vmem:[#allocation2 + $0x8] sm:$0xff] }
   0xf   :  { %v105_v29 = vld [vmem:[%s210_s1] ss:$0 sm:$0xff]  ;;  %s164_s22 = smov [#allocation5]  }
  0x10   :  { %v32_v1 = vand.u32 127, %v31_v0  ;;  %v106_v31 = vld [vmem:[%s211_s2] ss:$0 sm:$0xff]  ;;  %s92_s23 = sshll.u32 %s164_s22, 4  ;;  %s93_s23 = int_to_ptr.vmem [resolvable:$true] %s92_s23 }
  0x11   :  { %s136_s24 = scalar_lea.vmem %s93_s23, 256  ;;  %p141_p6 = scmp.lt.s32.totalorder %s93_s23, %s93_s23 }
  0x12   :  { %vm33_vm0 = vcmp.lt.s32.totalorder %v32_v1, 48  ;;  %p137_p5 = scmp.ne.s32.totalorder %s93_s23, %s136_s24  ;;  %p142_p7 = scmp.lt.s32.totalorder %s136_s24, %s136_s24 }
  0x13   :  { %v104_v3 = vsel %vm33_vm0, 1.0, %v163_v2 }
  0x14   :  { %v36_v6 = vmul.f32 %v104_v3, %v29_v4  ;;  %v37_v7 = vmul.f32 %v104_v3, %v30_v5  ;;  %p143_p8 = por %p142_p7, %p141_p6 }
  0x16   :  { %v39_v8 = vsel %vm38_vm1, %v36_v6, 0.0  ;;  %v42_v9 = vsel %vm38_vm1, %v37_v7, 0.0  ;;  %p144_p9 = pnand %p143_p8, %p137_p5 }
  0x17   :  { %40 = vadd.xlane.f32.xlu0 %v39_v8 }
  0x1b   :  { %43 = vadd.xlane.f32.xlu0 %v42_v9 }
  0xa0   :  { %v41_v10 = vpop.xlane.xlu0 %40 }
  0xa1   :  { %v45_v11 = vmul.f32 0.020833334, %v41_v10 }
  0xa3   :  { %v47_v12 = vsub.f32 %v29_v4, %v45_v11 }
  0xa4   :  { %v44_v13 = vpop.xlane.xlu0 %43 }
  0xa5   :  { %v46_v14 = vmul.f32 0.020833334, %v44_v13  ;;  %v49_v15 = vmul.f32 %v104_v3, %v47_v12 }
  0xa7   :  { %v48_v16 = vsub.f32 %v30_v5, %v46_v14  ;;  %v51_v17 = vmul.f32 %v49_v15, %v49_v15 }
  0xa9   :  { %v50_v18 = vmul.f32 %v104_v3, %v48_v16  ;;  %v53_v19 = vsel %vm38_vm1, %v51_v17, 0.0 }
  0xaa   :  { %54 = vadd.xlane.f32.xlu1 %v53_v19 }
  0xab   :  { %v52_v20 = vmul.f32 %v50_v18, %v50_v18 }
  0xad   :  { %v56_v21 = vsel %vm38_vm1, %v52_v20, 0.0 }
  0xae   :  { %57 = vadd.xlane.f32.xlu1 %v56_v21 }
 0x133   :  { %v55_v22 = vpop.xlane.xlu1 %54 }
 0x134   :  { %v59_v23 = vmul.f32 0.020833334, %v55_v22 }
 0x136   :  { %v61_v24 = vadd.f32 1e-05, %v59_v23 }
 0x137   :  { %v58_v25 = vpop.xlane.xlu1 %57 }
 0x138   :  { %112 = vrsqrt.f32 %v61_v24  ;;  %v60_v26 = vmul.f32 0.020833334, %v58_v25 }
 0x13a   :  { %v62_v27 = vadd.f32 1e-05, %v60_v26 }
 0x13c   :  { %114 = vrsqrt.f32 %v62_v27 }
 0x145   :  { %v113_v28 = vpop.eup %112 }
 0x146   :  { %v67_v30 = vmul.f32 %v113_v28, %v49_v15 }
 0x148   :  { %v75_v32 = vmul.f32 %v105_v29, %v67_v30 }
 0x149   :  { %v115_v33 = vpop.eup %114 }
 0x14a   :  { %v68_v34 = vmul.f32 %v115_v33, %v50_v18  ;;  %v83_v35 = vadd.f32 %v106_v31, %v75_v32 }
 0x14c   :  { %v76_v36 = vmul.f32 %v105_v29, %v68_v34  ;;  %85 = vst.msk [vmem:[#allocation5] sm:$0xff] %vm38_vm1, %v83_v35 }
 0x14e   :  { %v84_v37 = vadd.f32 %v106_v31, %v76_v36 }
 0x150   :  { %86 = vst.msk [vmem:[#allocation5 + $0x8] sm:$0xff] %vm38_vm1, %v84_v37 }
 0x151   :  { %147 = shalt.err (!%p144_p9)
}
 0x152   :  { %98 = dma.vmem_to_hbm [thread:$0]  %s93_s23, 256, %s212_s3, [#allocation4], %s161_s15, %s161_s15, %s162_s16  }
 0x153   :  { %158 = dma.done.wait [#allocation4], 256  }
 0x154   :  { %159 = vsyncadd [#allocation4], 4294967040 }
 0x155   :  { %102 = vsyncpa [#allocation3], 1 }
 0x156   :  { %103 = vsyncpa [#allocation4], 1 }

</bundles_post_ra>
